<compile_context>
chip_gen: v7x
topology: tpu7x:2x2x1
jax: 0.10.0
libtpu: 0.0.40
codegen_flags: <defaults>
</compile_context>

<pallas_src>
import functools

import jax
import jax.numpy as jnp
from jax.experimental import pallas as pl
from jax.experimental.pallas import tpu as pltpu


# --------------------------- fused single-pass kernel ------------------------

def _se_fused_kernel(x_ref, w1_ref, b1_ref, w2_ref, b2_ref, o_ref, *, inv_hw):
    # x_ref/o_ref: (TB, C, HW) native dtype; weights already f32 (hoisted cast).
    # Global average pool over the lane (spatial) axis with f32 accumulation.
    pooled = jnp.sum(x_ref[...], axis=2, dtype=jnp.float32) * inv_hw        # (TB, C)

    # fc1 + ReLU:  pooled @ W1^T  (contract the channel axes; no transposes).
    h = jax.lax.dot_general(
        pooled, w1_ref[...],
        dimension_numbers=(((1,), (1,)), ((), ())),
        preferred_element_type=jnp.float32)
    h = jnp.maximum(h + b1_ref[...], 0.0)                                   # (TB, Cr)

    # fc2 + sigmoid.
    s = jax.lax.dot_general(
        h, w2_ref[...],
        dimension_numbers=(((1,), (1,)), ((), ())),
        preferred_element_type=jnp.float32)
    s = jax.nn.sigmoid(s + b2_ref[...])                                     # (TB, C)

    scale = s.astype(o_ref.dtype)[:, :, None]                               # (TB, C, 1)
    # Re-read x from the VMEM input buffer for the rescale: do NOT hold the
    # multi-MiB tile live in vregs across the FC matmuls (no spill traffic).
    o_ref[...] = x_ref[...] * scale


# ----------------------- two-pass fallback (huge C*HW) -----------------------

def _pool_kernel(x_ref, o_ref, *, hw, hw_tile):
    # grid = (B, n_hw); o_ref (1, C, 1) f32 acts as the accumulator (resident
    # across the hw axis because its block index ignores j).
    j = pl.program_id(1)

    @pl.when(j == 0)
    def _():
        o_ref[...] = jnp.zeros_like(o_ref)

    x = x_ref[...]                                            # (1, C, hw_tile)
    lane = jax.lax.broadcasted_iota(jnp.int32, x.shape, 2)
    valid = (j * hw_tile + lane) < hw                         # mask padded lanes
    xs = jnp.where(valid, x, jnp.zeros_like(x)).astype(jnp.float32)
    o_ref[...] += jnp.sum(xs, axis=2, keepdims=True)          # (1, C, 1)


def _rescale_kernel(s_ref, x_ref, o_ref):
    # s_ref (1, C, 1) f32 ; x_ref/o_ref (1, C, hw_tile) native dtype.
    o_ref[...] = x_ref[...] * s_ref[...].astype(o_ref.dtype)


# ------------------------------ tiling policy --------------------------------

def _tpu_policy():
    """Generation-aware VMEM budget / TensorCore count."""
    vmem_cap = 128 << 20
    try:
        info = pltpu.get_tpu_info()
        vmem_cap = int(getattr(info, "vmem_capacity_bytes", vmem_cap))
    except Exception:
        pass
    kind = ""
    try:
        kind = jax.devices()[0].device_kind.lower()
    except Exception:
        pass
    two_tc = ("v7" in kind) or (vmem_cap <= (64 << 20))
    if two_tc:
        # v7x: 64 MiB VMEM per TC, 2 TCs/chip -> conservative tile budget.
        return {"num_tc": 2, "budget": 24 << 20, "vmem_limit": 32 << 20}
    # v5e / v6e: single TC, 128 MiB VMEM -> big tiles, raised scoped limit.
    return {"num_tc": 1, "budget": 80 << 20, "vmem_limit": 100 << 20}


def _pick_batch_tile(batch, row_bytes, budget_bytes, num_tc):
    """Largest divisor of `batch` whose double-buffered 2-in + 2-out blocks fit
    the budget; on multi-TC parts keep >= num_tc steps and prefer a step count
    divisible by num_tc so no core idles on the last step."""
    cap = max(1, budget_bytes // (4 * row_bytes))
    if num_tc > 1 and batch >= num_tc:
        cap = min(cap, batch // num_tc)
    cap = max(1, min(cap, batch))
    best = 1
    for tb in range(cap, 0, -1):
        if batch % tb:
            continue
        if num_tc == 1 or (batch // tb) % num_tc == 0:
            return tb
        best = max(best, tb)
    return best


# --------------------------------- wrappers -----------------------------------

def _se_single_pass(x_flat, w1f, b1f, w2f, b2f, policy):
    B, C, HW = x_flat.shape
    Cr = w1f.shape[0]
    itemsize = jnp.dtype(x_flat.dtype).itemsize

    tb = _pick_batch_tile(B, C * HW * itemsize, policy["budget"], policy["num_tc"])
    kernel = functools.partial(_se_fused_kernel, inv_hw=float(1.0 / HW))

    weight_bytes = 4 * int(w1f.size + w2f.size + b1f.size + b2f.size)
    cost = pl.CostEstimate(
        flops=int(2 * B * C * HW + 4 * B * C * Cr),   # pool + rescale + 2 FCs
        transcendentals=int(B * C),                    # sigmoid
        bytes_accessed=int(2 * B * C * HW * itemsize + weight_bytes),
    )

    return pl.pallas_call(
        kernel,
        out_shape=jax.ShapeDtypeStruct((B, C, HW), x_flat.dtype),
        grid_spec=pltpu.PrefetchScalarGridSpec(
            num_scalar_prefetch=0,
            grid=(B // tb,),
            in_specs=[
                pl.BlockSpec((tb, C, HW), lambda b: (b, 0, 0)),
                pl.BlockSpec((Cr, C), lambda b: (0, 0)),
                pl.BlockSpec((1, Cr), lambda b: (0, 0)),
                pl.BlockSpec((C, Cr), lambda b: (0, 0)),
                pl.BlockSpec((1, C), lambda b: (0, 0)),
            ],
            out_specs=pl.BlockSpec((tb, C, HW), lambda b: (b, 0, 0)),
        ),
        compiler_params=pltpu.CompilerParams(
            dimension_semantics=("parallel",),
            vmem_limit_bytes=policy["vmem_limit"],
        ),
        cost_estimate=cost,
    )(x_flat, w1f, b1f, w2f, b2f)


def _se_two_pass(x_flat, w1f, b1f, w2f, b2f, policy, hw_tile):
    # Fallback when a single (C, HW) batch row cannot be double-buffered in
    # VMEM (mainly v7x 64 MiB): pool kernel over HW tiles, tiny (B,C)-sized
    # FCs in plain JAX, then an HW-tiled rescale kernel.  One extra HBM read
    # of x (1.5x traffic) but never spills or fails to compile.
    B, C, HW = x_flat.shape
    itemsize = jnp.dtype(x_flat.dtype).itemsize

    if hw_tile is None:
        hw_tile = max(128, (policy["budget"] // (4 * C * itemsize)) // 128 * 128)
    if hw_tile >= HW:
        hw_tile = HW
    n_hw = pl.cdiv(HW, hw_tile)

    pooled = pl.pallas_call(
        functools.partial(_pool_kernel, hw=HW, hw_tile=hw_tile),
        out_shape=jax.ShapeDtypeStruct((B, C, 1), jnp.float32),
        grid_spec=pltpu.PrefetchScalarGridSpec(
            num_scalar_prefetch=0,
            grid=(B, n_hw),
            in_specs=[pl.BlockSpec((1, C, hw_tile), lambda b, j: (b, 0, j))],
            out_specs=pl.BlockSpec((1, C, 1), lambda b, j: (b, 0, 0)),
        ),
        compiler_params=pltpu.CompilerParams(
            dimension_semantics=("parallel", "arbitrary"),
            vmem_limit_bytes=policy["vmem_limit"],
        ),
        cost_estimate=pl.CostEstimate(
            flops=int(B * C * HW), transcendentals=0,
            bytes_accessed=int(B * C * HW * itemsize + B * C * 4)),
    )(x_flat)

    # Bottleneck FCs on a (B, C) matrix: negligible next to the HW passes.
    pooled = pooled.reshape(B, C) * (1.0 / HW)
    h = jnp.maximum(pooled @ w1f.T + b1f, 0.0)
    s = jax.nn.sigmoid(h @ w2f.T + b2f)
    s = s.reshape(B, C, 1).astype(jnp.float32)

    return pl.pallas_call(
        _rescale_kernel,
        out_shape=jax.ShapeDtypeStruct((B, C, HW), x_flat.dtype),
        grid_spec=pltpu.PrefetchScalarGridSpec(
            num_scalar_prefetch=0,
            grid=(B, n_hw),
            in_specs=[
                pl.BlockSpec((1, C, 1), lambda b, j: (b, 0, 0)),
                pl.BlockSpec((1, C, hw_tile), lambda b, j: (b, 0, j)),
            ],
            out_specs=pl.BlockSpec((1, C, hw_tile), lambda b, j: (b, 0, j)),
        ),
        compiler_params=pltpu.CompilerParams(
            dimension_semantics=("parallel", "parallel"),
            vmem_limit_bytes=policy["vmem_limit"],
        ),
        cost_estimate=pl.CostEstimate(
            flops=int(B * C * HW), transcendentals=0,
            bytes_accessed=int(2 * B * C * HW * itemsize + B * C * 4)),
    )(s, x_flat)


def attention_channel(x_nchw, w1, b1, w2, b2, *,
                      force_two_pass=False, two_pass_hw_tile=None):
    """x_nchw: (B, C, H, W). w1: (Cr, C), b1: (Cr,), w2: (C, Cr), b2: (C,)."""
    B, C, H, W = x_nchw.shape
    Cr = w1.shape[0]
    HW = H * W
    itemsize = jnp.dtype(x_nchw.dtype).itemsize

    # Flatten spatial onto the lane axis; NO padding (full-dim blocks are
    # exempt from the 128 rule) so we avoid two extra HBM copies of x.
    x_flat = x_nchw.reshape(B, C, HW)

    # Hoist parameter casts out of the kernel: the constant index_map keeps
    # weights VMEM-resident across grid steps, so cast once here, not per step.
    w1f = w1.astype(jnp.float32)
    w2f = w2.astype(jnp.float32)
    b1f = b1.reshape(1, Cr).astype(jnp.float32)
    b2f = b2.reshape(1, C).astype(jnp.float32)

    policy = _tpu_policy()
    row_bytes = C * HW * itemsize
    single_pass = (not force_two_pass) and (4 * row_bytes <= policy["budget"])

    if single_pass:
        out = _se_single_pass(x_flat, w1f, b1f, w2f, b2f, policy)
    else:
        out = _se_two_pass(x_flat, w1f, b1f, w2f, b2f, policy, two_pass_hw_tile)
    return out.reshape(B, C, H, W)


# --------------------------------- reference ----------------------------------

def attention_channel_ref(x, w1, b1, w2, b2):
    """Pure-JAX reference matching the PyTorch forward exactly."""
    pooled = jnp.mean(x, axis=(2, 3))                  # (B, C)
    h = jnp.maximum(pooled @ w1.T + b1, 0.0)           # (B, Cr)
    s = jax.nn.sigmoid(h @ w2.T + b2)                  # (B, C)
    return x * s[:, :, None, None]


def _run_case(key, B, C, H, W, se_bn, **kw):
    Cr = max(1, C // se_bn)
    kx, k1, k2, k3, k4 = jax.random.split(key, 5)
    x = jax.random.normal(kx, (B, C, H, W), dtype=jnp.float32)
    w1 = jax.random.normal(k1, (Cr, C), dtype=jnp.float32) * 0.1   # fc1.weight
    b1 = jax.random.normal(k2, (Cr,), dtype=jnp.float32) * 0.1     # fc1.bias
    w2 = jax.random.normal(k3, (C, Cr), dtype=jnp.float32) * 0.1   # fc2.weight
    b2 = jax.random.normal(k4, (C,), dtype=jnp.float32) * 0.1      # fc2.bias

    out = jax.block_until_ready(attention_channel(x, w1, b1, w2, b2, **kw))
    ref = attention_channel_ref(x, w1, b1, w2, b2)
    assert out.shape == (B, C, H, W)
    assert jnp.allclose(out, ref, atol=1e-5, rtol=1e-5), (
        "max abs err %e" % float(jnp.max(jnp.abs(out - ref))))


if __name__ == "__main__":
    key = jax.random.PRNGKey(0)
    k0, k1, k2 = jax.random.split(key, 3)

    # HW a multiple of 128 (se_bn=16 -> Cr=4): fused single-pass path.
    _run_case(k0, B=2, C=64, H=16, W=16, se_bn=16)
    # Non-128-multiple HW (7*7=49): unpadded full-dim block, masked stores.
    _run_case(k1, B=4, C=32, H=7, W=7, se_bn=16)
    # Exercise the big-layer two-pass fallback (pool -> FC -> rescale) with a
    # partial last HW tile (200 lanes / 128 tile) to validate lane masking.
    _run_case(k2, B=2, C=16, H=10, W=20, se_bn=8,
              force_two_pass=True, two_pass_hw_tile=128)

    print("KERNEL_OK")
</pallas_src>

<mosaic_0001>
module attributes {stable_mosaic.version = 11 : i64} {
  func.func @_se_fused_kernel(%arg0: i32, %arg1: memref<2x64x256xf32, #tpu.memory_space<vmem>>, %arg2: memref<4x64xf32, #tpu.memory_space<vmem>>, %arg3: memref<1x4xf32, #tpu.memory_space<vmem>>, %arg4: memref<64x4xf32, #tpu.memory_space<vmem>>, %arg5: memref<1x64xf32, #tpu.memory_space<vmem>>, %arg6: memref<2x64x256xf32, #tpu.memory_space<vmem>>) attributes {dimension_semantics = [#tpu.dimension_semantics<parallel>], iteration_bounds = array<i64: 1>, scalar_prefetch = 0 : i64, scratch_operands = 0 : i64, tpu.core_type = #tpu.core_type<tc>, window_params = [{transform_indices = @transform_0, window_bounds = array<i64: 2, 64, 256>}, {pipeline_mode = #tpu.pipeline_mode<synchronous>, transform_indices = @transform_1, window_bounds = array<i64: 4, 64>}, {pipeline_mode = #tpu.pipeline_mode<synchronous>, transform_indices = @transform_2, window_bounds = array<i64: 1, 4>}, {pipeline_mode = #tpu.pipeline_mode<synchronous>, transform_indices = @transform_3, window_bounds = array<i64: 64, 4>}, {pipeline_mode = #tpu.pipeline_mode<synchronous>, transform_indices = @transform_4, window_bounds = array<i64: 1, 64>}, {transform_indices = @transform_5, window_bounds = array<i64: 2, 64, 256>}]} {
    %c0 = arith.constant 0 : index
    %c0_0 = arith.constant 0 : index
    %c0_1 = arith.constant 0 : index
    %0 = vector.load %arg1[%c0, %c0_0, %c0_1] : memref<2x64x256xf32, #tpu.memory_space<vmem>>, vector<2x64x256xf32>
    %cst = arith.constant dense<0.000000e+00> : vector<2x64xf32>
    %1 = vector.multi_reduction <add>, %0, %cst [2] : vector<2x64x256xf32> to vector<2x64xf32>
    %cst_2 = arith.constant 3.906250e-03 : f32
    %2 = vector.broadcast %cst_2 : f32 to vector<2x64xf32>
    %3 = arith.mulf %1, %2 : vector<2x64xf32>
    %c0_3 = arith.constant 0 : index
    %c0_4 = arith.constant 0 : index
    %4 = vector.load %arg2[%c0_3, %c0_4] : memref<4x64xf32, #tpu.memory_space<vmem>>, vector<4x64xf32>
    %cst_5 = arith.constant dense<0.000000e+00> : vector<2x4xf32>
    %5 = tpu.matmul %3, %4, %cst_5 {dimension_numbers = #tpu.dot_dimension_numbers<[1], [1], [0], [0], [0, 0, 1, 0], [], []>} : vector<2x64xf32>, vector<4x64xf32>, vector<2x4xf32> -> vector<2x4xf32>
    %c0_6 = arith.constant 0 : index
    %c0_7 = arith.constant 0 : index
    %6 = vector.load %arg3[%c0_6, %c0_7] : memref<1x4xf32, #tpu.memory_space<vmem>>, vector<1x4xf32>
    %7 = vector.broadcast %6 : vector<1x4xf32> to vector<2x4xf32>
    %8 = arith.addf %5, %7 : vector<2x4xf32>
    %cst_8 = arith.constant 0.000000e+00 : f32
    %9 = vector.broadcast %cst_8 : f32 to vector<2x4xf32>
    %10 = arith.maximumf %8, %9 : vector<2x4xf32>
    %c0_9 = arith.constant 0 : index
    %c0_10 = arith.constant 0 : index
    %11 = vector.load %arg4[%c0_9, %c0_10] : memref<64x4xf32, #tpu.memory_space<vmem>>, vector<64x4xf32>
    %cst_11 = arith.constant dense<0.000000e+00> : vector<2x64xf32>
    %12 = tpu.matmul %10, %11, %cst_11 {dimension_numbers = #tpu.dot_dimension_numbers<[1], [1], [0], [0], [0, 0, 1, 0], [], []>} : vector<2x4xf32>, vector<64x4xf32>, vector<2x64xf32> -> vector<2x64xf32>
    %c0_12 = arith.constant 0 : index
    %c0_13 = arith.constant 0 : index
    %13 = vector.load %arg5[%c0_12, %c0_13] : memref<1x64xf32, #tpu.memory_space<vmem>>, vector<1x64xf32>
    %14 = vector.broadcast %13 : vector<1x64xf32> to vector<2x64xf32>
    %15 = arith.addf %12, %14 : vector<2x64xf32>
    %16 = arith.negf %15 : vector<2x64xf32>
    %17 = math.exp %16 : vector<2x64xf32>
    %cst_14 = arith.constant 1.000000e+00 : f32
    %18 = vector.broadcast %cst_14 : f32 to vector<2x64xf32>
    %19 = arith.addf %18, %17 : vector<2x64xf32>
    %20 = arith.divf %18, %19 : vector<2x64xf32>
    %21 = vector.shape_cast %20 : vector<2x64xf32> to vector<2x64x1xf32>
    %c0_15 = arith.constant 0 : index
    %c0_16 = arith.constant 0 : index
    %c0_17 = arith.constant 0 : index
    %22 = vector.load %arg1[%c0_15, %c0_16, %c0_17] : memref<2x64x256xf32, #tpu.memory_space<vmem>>, vector<2x64x256xf32>
    %23 = vector.broadcast %21 : vector<2x64x1xf32> to vector<2x64x256xf32>
    %24 = arith.mulf %22, %23 : vector<2x64x256xf32>
    %c0_18 = arith.constant 0 : index
    %c0_19 = arith.constant 0 : index
    %c0_20 = arith.constant 0 : index
    %25 = vector.load %arg6[%c0_18, %c0_19, %c0_20] : memref<2x64x256xf32, #tpu.memory_space<vmem>>, vector<2x64x256xf32>
    tpu.vector_store %arg6[%c0_18, %c0_19, %c0_20], %24 {strides = array<i32>} : memref<2x64x256xf32, #tpu.memory_space<vmem>>, vector<2x64x256xf32>,
    return
  }
  func.func @transform_0(%arg0: i32) -> (i32, i32, i32) {
    %c0_i32 = arith.constant 0 : i32
    %c0_i32_0 = arith.constant 0 : i32
    %c0_i32_1 = arith.constant 0 : i32
    return %arg0, %c0_i32, %c0_i32_0 : i32, i32, i32
  }
  func.func @transform_1(%arg0: i32) -> (i32, i32) {
    %c0_i32 = arith.constant 0 : i32
    %c0_i32_0 = arith.constant 0 : i32
    %c0_i32_1 = arith.constant 0 : i32
    return %c0_i32, %c0_i32_0 : i32, i32
  }
  func.func @transform_2(%arg0: i32) -> (i32, i32) {
    %c0_i32 = arith.constant 0 : i32
    %c0_i32_0 = arith.constant 0 : i32
    %c0_i32_1 = arith.constant 0 : i32
    return %c0_i32, %c0_i32_0 : i32, i32
  }
  func.func @transform_3(%arg0: i32) -> (i32, i32) {
    %c0_i32 = arith.constant 0 : i32
    %c0_i32_0 = arith.constant 0 : i32
    %c0_i32_1 = arith.constant 0 : i32
    return %c0_i32, %c0_i32_0 : i32, i32
  }
  func.func @transform_4(%arg0: i32) -> (i32, i32) {
    %c0_i32 = arith.constant 0 : i32
    %c0_i32_0 = arith.constant 0 : i32
    %c0_i32_1 = arith.constant 0 : i32
    return %c0_i32, %c0_i32_0 : i32, i32
  }
  func.func @transform_5(%arg0: i32) -> (i32, i32, i32) {
    %c0_i32 = arith.constant 0 : i32
    %c0_i32_0 = arith.constant 0 : i32
    %c0_i32_1 = arith.constant 0 : i32
    return %arg0, %c0_i32, %c0_i32_0 : i32, i32, i32
  }
}

</mosaic_0001>

<bundles_post_ra>
// kernel: tpu_custom_call.1
= control target key start
LH: loop header
LB: loop body
LE: loop exit
PB: predicated region body
PF: predicated region fallthrough
CT: control target
= control target key end

     0   :  { %10 = vsyncpa [#allocation3], 0  ;;  %s1167_s0 = inlined_call_operand.hbm [shape: f32[2,64,256], index: 0, kind: input, shape index: {}]   ;;  %s1168_s1 = inlined_call_operand.hbm [shape: f32[4,64], index: 1, kind: input, shape index: {}]   ;;  %s1169_s2 = inlined_call_operand.hbm [shape: f32[1,4], index: 2, kind: input, shape index: {}]   ;;  %s1170_s3 = inlined_call_operand.hbm [shape: f32[64,4], index: 3, kind: input, shape index: {}]   ;;  %s1171_s4 = inlined_call_operand.hbm [shape: f32[1,64], index: 4, kind: input, shape index: {}]   ;;  %s1172_s5 = inlined_call_operand.hbm [shape: f32[2,64,256], index: 5, kind: output, shape index: {}]  }
   0x1   :  { %11 = vsyncpa [#allocation6], 0 }
   0x2   :  { %12 = vsyncpa [#allocation9], 0 }
   0x3   :  { %13 = vsyncpa [#allocation4], 0  ;;  %s870_s18 = smov [#allocation5]   ;;  %s871_s20 = smov [#allocation8]  }
   0x4   :  { %s32_s19 = sshll.u32 %s870_s18, 4  ;;  %s51_s21 = sshll.u32 %s871_s20, 4  ;;  %s33_s19 = int_to_ptr.vmem [resolvable:$true] %s32_s19  ;;  %s913_s21 = int_to_ptr.vmem [resolvable:$true] %s51_s21 }
   0x5   :  { %s730_s24 = scalar_lea.hbm %s1168_s1, 64 }
   0x6   :  { %p731_p0 = scmp.ne.s32.totalorder %s1168_s1, %s730_s24  ;;  %p734_p1 = scmp.lt.u32.totalorder %s730_s24, %s1168_s1 }
   0x8   :  { %p736_p2 = pnand %p734_p1, %p731_p0 }
   0xa   :  { %739 = shalt.err (!%p736_p2)
}
   0xb   :  { %s740_s29 = scalar_lea.vmem %s33_s19, 64  ;;  %p745_p4 = scmp.lt.s32.totalorder %s33_s19, %s33_s19 }
   0xc   :  { %p741_p3 = scmp.ne.s32.totalorder %s33_s19, %s740_s29  ;;  %p746_p5 = scmp.lt.s32.totalorder %s740_s29, %s740_s29 }
   0xe   :  { %p747_p6 = por %p746_p5, %p745_p4 }
  0x10   :  { %p748_p7 = pnand %p747_p6, %p741_p3 }
  0x12   :  { %751 = shalt.err (!%p748_p7)
}
  0x13   :  { %35 = dma.hbm_to_vmem [thread:$0]  %s1168_s1, 64, %s33_s19, [#allocation6]  }
  0x14   :  { %s752_s9 = scalar_lea.hbm %s1170_s3, 1024 }
  0x15   :  { %p753_p8 = scmp.ne.s32.totalorder %s1170_s3, %s752_s9  ;;  %p756_p9 = scmp.lt.u32.totalorder %s752_s9, %s1170_s3 }
  0x17   :  { %p758_p10 = pnand %p756_p9, %p753_p8 }
  0x19   :  { %761 = shalt.err (!%p758_p10)
}
  0x1a   :  { %s762_s14 = scalar_lea.vmem %s913_s21, 1024  ;;  %p767_p12 = scmp.lt.s32.totalorder %s913_s21, %s913_s21 }
  0x1b   :  { %p763_p11 = scmp.ne.s32.totalorder %s913_s21, %s762_s14  ;;  %p768_p13 = scmp.lt.s32.totalorder %s762_s14, %s762_s14 }
  0x1d   :  { %p769_p0 = por %p768_p13, %p767_p12 }
  0x1f   :  { %p770_p1 = pnand %p769_p0, %p763_p11 }
  0x21   :  { %773 = shalt.err (!%p770_p1)
}
  0x22   :  { %s872_s1 = smov 128   ;;  %s873_s15 = smov 8  }
  0x23   :  { %57 = dma.hbm_to_vmem [thread:$0]  %s1170_s3, 1024, %s913_s21, [#allocation9], %s872_s1, %s872_s1, %s873_s15  }
  0x24   :  { %s874_s18 = smov [#allocation2]   ;;  %s774_s23 = scalar_lea.hbm %s1167_s0, 4096 }
  0x25   :  { %s19_s19 = sshll.u32 %s874_s18, 4  ;;  %p775_p2 = scmp.ne.s32.totalorder %s1167_s0, %s774_s23  ;;  %s20_s19 = int_to_ptr.vmem [resolvable:$true] %s19_s19 }
  0x26   :  { %p778_p3 = scmp.lt.u32.totalorder %s774_s23, %s1167_s0 }
  0x28   :  { %p780_p4 = pnand %p778_p3, %p775_p2 }
  0x2a   :  { %783 = shalt.err (!%p780_p4)
}
  0x2b   :  { %s784_s28 = scalar_lea.vmem %s20_s19, 4096  ;;  %p789_p6 = scmp.lt.s32.totalorder %s20_s19, %s20_s19 }
  0x2c   :  { %p785_p5 = scmp.ne.s32.totalorder %s20_s19, %s784_s28  ;;  %p790_p7 = scmp.lt.s32.totalorder %s784_s28, %s784_s28 }
  0x2e   :  { %p791_p8 = por %p790_p7, %p789_p6 }
  0x30   :  { %p792_p9 = pnand %p791_p8, %p785_p5 }
  0x32   :  { %795 = shalt.err (!%p792_p9)
}
  0x33   :  { %s875_s3 = smov 256   ;;  %s876_s21 = smov 16  }
  0x34   :  { %25 = dma.hbm_to_vmem [thread:$0]  %s1167_s0, 4096, %s20_s19, [#allocation3], %s875_s3, %s875_s3, %s876_s21  }
  0x35   :  { %s877_s6 = smov [#allocation7]   ;;  %s878_s8 = smov [#allocation10]  }
  0x36   :  { %s42_s7 = sshll.u32 %s877_s6, 4  ;;  %s64_s9 = sshll.u32 %s878_s8, 4  ;;  %s43_s7 = int_to_ptr.vmem [resolvable:$true] %s42_s7  ;;  %s65_s9 = int_to_ptr.vmem [resolvable:$true] %s64_s9 }
  0x37   :  { %s796_s12 = scalar_lea.hbm %s1169_s2, 16 }
  0x38   :  { %p797_p10 = scmp.ne.s32.totalorder %s1169_s2, %s796_s12  ;;  %p800_p11 = scmp.lt.u32.totalorder %s796_s12, %s1169_s2 }
  0x3a   :  { %p802_p12 = pnand %p800_p11, %p797_p10 }
  0x3c   :  { %805 = shalt.err (!%p802_p12)
}
  0x3d   :  { %s806_s0 = scalar_lea.vmem %s43_s7, 16  ;;  %s810_s16 = scalar_lea.vmem %s43_s7, 32 }
  0x3e   :  { %p807_p13 = scmp.ne.s32.totalorder %s43_s7, %s806_s0  ;;  %p811_p0 = scmp.lt.s32.totalorder %s43_s7, %s43_s7 }
  0x3f   :  { %p812_p1 = scmp.lt.s32.totalorder %s810_s16, %s806_s0 }
  0x41   :  { %p813_p2 = por %p812_p1, %p811_p0 }
  0x43   :  { %p814_p3 = pnand %p813_p2, %p807_p13 }
  0x45   :  { %817 = shalt.err (!%p814_p3)
}
  0x46   :  { %45 = dma.hbm_to_vmem [thread:$0]  %s1169_s2, 16, %s43_s7, [#allocation6]  }
  0x47   :  { %s818_s22 = scalar_lea.hbm %s1171_s4, 16 }
  0x48   :  { %p819_p4 = scmp.ne.s32.totalorder %s1171_s4, %s818_s22  ;;  %p822_p5 = scmp.lt.u32.totalorder %s818_s22, %s1171_s4 }
  0x4a   :  { %p824_p6 = pnand %p822_p5, %p819_p4 }
  0x4c   :  { %827 = shalt.err (!%p824_p6)
}
  0x4d   :  { %s828_s27 = scalar_lea.vmem %s65_s9, 16  ;;  %s832_s28 = scalar_lea.vmem %s65_s9, 32 }
  0x4e   :  { %p829_p7 = scmp.ne.s32.totalorder %s65_s9, %s828_s27  ;;  %p833_p8 = scmp.lt.s32.totalorder %s65_s9, %s65_s9 }
  0x4f   :  { %p834_p9 = scmp.lt.s32.totalorder %s832_s28, %s828_s27 }
  0x51   :  { %p835_p10 = por %p834_p9, %p833_p8 }
  0x53   :  { %p836_p11 = pnand %p835_p10, %p829_p7 }
  0x55   :  { %839 = shalt.err (!%p836_p11)
}
  0x56   :  { %67 = dma.hbm_to_vmem [thread:$0]  %s1171_s4, 16, %s65_s9, [#allocation9]  }
  0x57   :  { %862 = dma.done.wait [#allocation3], 4096  }
  0x58   :  { %863 = vsyncadd [#allocation3], 4294963200 }
  0x59   :  { %864 = dma.done.wait [#allocation6], 80  }
  0x5a   :  { %865 = vsyncadd [#allocation6], 4294967216 }
  0x5b   :  { %866 = dma.done.wait [#allocation9], 1040  }
  0x5c   :  { %867 = vsyncadd [#allocation9], 4294966256  ;;  %v983_v0 = vld [vmem:[#allocation2 + $0x80] sm:$0xff]  ;;  %v985_v1 = vld [vmem:[#allocation2 + $0x88] sm:$0xff]  ;;  %v879_v48 = vmov 0.0   ;;  %vm299_vm0 = vcmask 523264  }
  0x5d   :  { %v987_v2 = vld [vmem:[#allocation2] sm:$0xff]  ;;  %v139_v3 = vadd.f32 %v985_v1, %v983_v0  ;;  %v991_v4 = vld [vmem:[#allocation2 + $0x8] sm:$0xff]  ;;  %v993_v5 = vld [vmem:[#allocation2 + $0x90] sm:$0xff]  ;;  %673 = vmatprep.subr.mxu0 %v879_v48  ;;  %vm880_vm1 = vmmov 0   ;;  %vm391_vm2 = vcmask 31744   ;;  %v881_v52 = vmov 0.0|0.0  }
  0x5e   :  { %v995_v6 = vld [vmem:[#allocation2 + $0x98] sm:$0xff]  ;;  %v115_v7 = vadd.f32 %v991_v4, %v987_v2  ;;  %v999_v8 = vld [vmem:[#allocation2 + $0x10] sm:$0xff]  ;;  %v1007_v12 = vld [vmem:[#allocation2 + $0xa0] sm:$0xff]  ;;  %675 = vmatprep.mubr.msk.f32.mxu0 %vm880_vm1, %v879_v48  ;;  %694 = vmatprep.mubr.msk.f32.mxu1 %vm880_vm1, %v879_v48  ;;  %vm214_vm4 = vcmask 130112   ;;  %vm221_vm5 = vcmask 195712   ;;  %vm228_vm6 = vcmask 261312  }
  0x5f   :  { %v1001_v9 = vld [vmem:[#allocation2 + $0x18] sm:$0xff]  ;;  %140 = vadd.xlane.f32.xlu1 %v139_v3  ;;  %v142_v10 = vadd.f32 %v995_v6, %v993_v5  ;;  %v1009_v13 = vld [vmem:[#allocation2 + $0xa8] sm:$0xff]  ;;  %v1011_v14 = vld [vmem:[#allocation2 + $0x20] sm:$0xff]  ;;  %697 = vmatprep.subr.bf16.mxu1 %v881_v52  ;;  %vm235_vm7 = vcmask 326912   ;;  %vm242_vm8 = vcmask 392512   ;;  %vm249_vm9 = vcmask 458112  }
  0x60   :  { %116 = vadd.xlane.f32.xlu0 %v115_v7  ;;  %v118_v11 = vadd.f32 %v1001_v9, %v999_v8  ;;  %v1013_v15 = vld [vmem:[#allocation2 + $0x28] sm:$0xff]  ;;  %v145_v16 = vadd.f32 %v1009_v13, %v1007_v12  ;;  %v1019_v18 = vld [vmem:[#allocation2 + $0xb0] sm:$0xff]  ;;  %v1021_v19 = vld [vmem:[#allocation2 + $0xb8] sm:$0xff]  ;;  %vm256_vm10 = vcmask 523712   ;;  %vm297_vm11 = vcmask 1041409   ;;  %s882_s4 = smov [#allocation11]  }
  0x61   :  { %v121_v17 = vadd.f32 %v1013_v15, %v1011_v14  ;;  %1180 = vst [vmem:[#allocation16_spill] sm:$0xff] %v1021_v19  ;;  %v1023_v20 = vld [vmem:[#allocation2 + $0x30] sm:$0xff]  ;;  %v1025_v21 = vld [vmem:[#allocation2 + $0x38] sm:$0xff]  ;;  %v148_v22 = vadd.f32 %v1021_v19, %v1019_v18  ;;  %v1031_v24 = vld [vmem:[#allocation2 + $0xc0] sm:$0xff]  ;;  %s634_s30 = sshll.u32 %s882_s4, 4  ;;  %s635_s30 = int_to_ptr.vmem [resolvable:$true] %s634_s30 }
  0x62   :  { %v124_v23 = vadd.f32 %v1025_v21, %v1023_v20  ;;  %v1033_v25 = vld [vmem:[#allocation2 + $0xc8] sm:$0xff]  ;;  %v1035_v26 = vld [vmem:[#allocation2 + $0x40] sm:$0xff]  ;;  %v1043_v30 = vld [vmem:[#allocation2 + $0xd0] sm:$0xff]  ;;  %s840_s6 = scalar_lea.vmem %s635_s30, 4096  ;;  %p845_p13 = scmp.lt.s32.totalorder %s635_s30, %s635_s30 }
  0x63   :  { %143 = vadd.xlane.f32.xlu1 %v142_v10  ;;  %v1037_v27 = vld [vmem:[#allocation2 + $0x48] sm:$0xff]  ;;  %v151_v28 = vadd.f32 %v1033_v25, %v1031_v24  ;;  %1181 = vst [vmem:[#allocation17_spill] sm:$0xff] %v1043_v30  ;;  %v1045_v31 = vld [vmem:[#allocation2 + $0xd8] sm:$0xff]  ;;  %v1047_v32 = vld [vmem:[#allocation2 + $0x50] sm:$0xff]  ;;  %p841_p12 = scmp.ne.s32.totalorder %s635_s30, %s840_s6  ;;  %p846_p0 = scmp.lt.s32.totalorder %s840_s6, %s840_s6 }
  0x64   :  { %119 = vadd.xlane.f32.xlu0 %v118_v11  ;;  %v127_v29 = vadd.f32 %v1037_v27, %v1035_v26  ;;  %1182 = vst [vmem:[#allocation18_spill] sm:$0xff] %v1045_v31  ;;  %v1049_v33 = vld [vmem:[#allocation2 + $0x58] sm:$0xff]  ;;  %v154_v34 = vadd.f32 %v1045_v31, %v1043_v30  ;;  %v1055_v36 = vld [vmem:[#allocation2 + $0xe0] sm:$0xff]  ;;  %v1057_v37 = vld [vmem:[#allocation2 + $0xe8] sm:$0xff] }
  0x65   :  { %v130_v35 = vadd.f32 %v1049_v33, %v1047_v32  ;;  %1183 = vst [vmem:[#allocation19_spill] sm:$0xff] %v1055_v36  ;;  %1184 = vst [vmem:[#allocation20_spill] sm:$0xff] %v1057_v37  ;;  %v1059_v38 = vld [vmem:[#allocation2 + $0x60] sm:$0xff]  ;;  %v1061_v39 = vld [vmem:[#allocation2 + $0x68] sm:$0xff]  ;;  %v157_v40 = vadd.f32 %v1057_v37, %v1055_v36  ;;  %p847_p1 = por %p846_p0, %p845_p13 }
  0x66   :  { %v133_v41 = vadd.f32 %v1061_v39, %v1059_v38  ;;  %v1067_v42 = vld [vmem:[#allocation2 + $0xf0] sm:$0xff]  ;;  %v1069_v43 = vld [vmem:[#allocation2 + $0xf8] sm:$0xff]  ;;  %v179_v49 = vld [vmem:[#allocation5] sm:$0xf] }
  0x67   :  { %146 = vadd.xlane.f32.xlu1 %v145_v16  ;;  %1185 = vst [vmem:[#allocation21_spill] sm:$0xff] %v1067_v42  ;;  %1186 = vst [vmem:[#allocation22_spill] sm:$0xff] %v1069_v43  ;;  %v1071_v44 = vld [vmem:[#allocation2 + $0x70] sm:$0xff]  ;;  %v1073_v45 = vld [vmem:[#allocation2 + $0x78] sm:$0xff]  ;;  %v160_v46 = vadd.f32 %v1069_v43, %v1067_v42  ;;  %674 = vmatpush3.xpose.msk.msra.mxu0 %vm299_vm0, %v179_v49  ;;  %v203_v16 = vlaneseq  ;;  %p848_p2 = pnand %p847_p1, %p841_p12 }
  0x68   :  { %122 = vadd.xlane.f32.xlu0 %v121_v17  ;;  %v136_v47 = vadd.f32 %v1073_v45, %v1071_v44  ;;  %v376_v50 = vld [vmem:[#allocation8] sm:$0xff]  ;;  %v377_v51 = vld [vmem:[#allocation8 + $0x8] sm:$0xff]  ;;  %vm1082_vm3 = vmpackc.low %vm391_vm2, %vm391_vm2 }
  0x69   :  { %v698_v53 = vpack.c.bf16 %v377_v51, %v376_v50  ;;  %v378_v55 = vld [vmem:[#allocation8 + $0x10] sm:$0xff]  ;;  %v379_v56 = vld [vmem:[#allocation8 + $0x18] sm:$0xff]  ;;  %v380_v58 = vld [vmem:[#allocation8 + $0x20] sm:$0xff] }
  0x6a   :  { %v702_v57 = vpack.c.bf16 %v379_v56, %v378_v55  ;;  %v381_v59 = vld [vmem:[#allocation8 + $0x28] sm:$0xff]  ;;  %v382_v61 = vld [vmem:[#allocation8 + $0x30] sm:$0xff]  ;;  %v383_v62 = vld [vmem:[#allocation8 + $0x38] sm:$0xff] }
  0x6b   :  { %149 = vadd.xlane.f32.xlu1 %v148_v22  ;;  %700 = vmatpush3.bf16.xpose.msk.msra.mxu1 %vm1082_vm3, %v698_v53  ;;  %v706_v60 = vpack.c.bf16 %v381_v59, %v380_v58  ;;  %v710_v63 = vpack.c.bf16 %v383_v62, %v382_v61 }
  0x6c   :  { %125 = vadd.xlane.f32.xlu0 %v124_v23  ;;  %701 = vmatprep.subr.bf16.mxu1 %v881_v52  ;;  %v204_v23 = vand.u32 127, %v203_v16 }
  0x6e   :  { %v237_v48 = vadd.s32 4294967256, %v204_v23  ;;  %v244_v53 = vadd.s32 4294967248, %v204_v23 }
  0x6f   :  { %152 = vadd.xlane.f32.xlu1 %v151_v28 }
  0x70   :  { %128 = vadd.xlane.f32.xlu0 %v127_v29  ;;  %v1094_v29 = vshrl.u32 %v203_v16, 7 }
  0x72   :  { %v207_v49 = vsub.s32 %v204_v23, %v1094_v29  ;;  %v240_v59 = vsub.s32 %v237_v48, %v1094_v29 }
  0x73   :  { %155 = vadd.xlane.f32.xlu1 %v154_v34  ;;  %704 = vmatpush3.bf16.xpose.msk.msra.mxu1 %vm1082_vm3, %v702_v57 }
  0x74   :  { %131 = vadd.xlane.f32.xlu0 %v130_v35  ;;  %705 = vmatprep.subr.bf16.mxu1 %v881_v52  ;;  %v209_v35 = vadd.s32 4294967288, %v204_v23 }
  0x76   :  { %v212_v51 = vsub.s32 %v209_v35, %v1094_v29 }
  0x77   :  { %158 = vadd.xlane.f32.xlu1 %v157_v40  ;;  %v216_v40 = vadd.s32 4294967280, %v204_v23 }
  0x78   :  { %134 = vadd.xlane.f32.xlu0 %v133_v41  ;;  %v223_v41 = vadd.s32 4294967272, %v204_v23 }
  0x7a   :  { %v226_v55 = vsub.s32 %v223_v41, %v1094_v29 }
  0x7b   :  { %161 = vadd.xlane.f32.xlu1 %v160_v46  ;;  %708 = vmatpush3.bf16.xpose.msk.msra.mxu1 %vm1082_vm3, %v706_v60  ;;  %v230_v46 = vadd.s32 4294967264, %v204_v23 }
  0x7c   :  { %137 = vadd.xlane.f32.xlu0 %v136_v47  ;;  %709 = vmatprep.subr.bf16.mxu1 %v881_v52  ;;  %v219_v52 = vsub.s32 %v216_v40, %v1094_v29 }
  0x7d   :  { %v233_v56 = vsub.s32 %v230_v46, %v1094_v29  ;;  %v251_v46 = vadd.s32 4294967240, %v204_v23 }
  0x7f   :  { %v254_v23 = vsub.s32 %v251_v46, %v1094_v29 }
  0x83   :  { %712 = vmatpush3.bf16.xpose.msk.msra.mxu1 %vm1082_vm3, %v710_v63 }
  0xec   :  { %v141_v3 = vpop.xlane.xlu1 %140 }
  0xed   :  { %v117_v7 = vpop.xlane.xlu0 %116  ;;  %v171_v61 = vmul.f32 0.00390625, %v141_v3 }
  0xee   :  { %v163_v35 = vmul.f32 0.00390625, %v117_v7 }
  0xef   :  { %v261_v37 = vrot.slane %v171_v61, %v207_v49 }
  0xf0   :  { %v144_v10 = vpop.xlane.xlu1 %143  ;;  %v208_v19 = vrot.slane %v163_v35, %v207_v49 }
  0xf1   :  { %v120_v11 = vpop.xlane.xlu0 %119  ;;  %v172_v54 = vmul.f32 0.00390625, %v144_v10  ;;  %v247_v10 = vsub.s32 %v244_v53, %v1094_v29 }
  0xf2   :  { %v164_v57 = vmul.f32 0.00390625, %v120_v11 }
  0xf3   :  { %v265_v41 = vrot.slane %v172_v54, %v212_v51 }
  0xf4   :  { %v147_v17 = vpop.xlane.xlu1 %146  ;;  %v213_v11 = vrot.slane %v164_v57, %v212_v51 }
  0xf5   :  { %v123_v22 = vpop.xlane.xlu0 %122  ;;  %v173_v58 = vmul.f32 0.00390625, %v147_v17  ;;  %v266_v53 = vsel %vm214_vm4, %v265_v41, %v261_v37  ;;  %v648_v41 = vld [vmem:[#allocation7] ss:$0 sm:$0xff] }
  0xf6   :  { %v165_v62 = vmul.f32 0.00390625, %v123_v22  ;;  %v215_v51 = vsel %vm214_vm4, %v213_v11, %v208_v19 }
  0xf7   :  { %v270_v17 = vrot.slane %v173_v58, %v219_v52 }
  0xf8   :  { %v150_v28 = vpop.xlane.xlu1 %149  ;;  %v220_v3 = vrot.slane %v165_v62, %v219_v52 }
  0xf9   :  { %v126_v34 = vpop.xlane.xlu0 %125  ;;  %v174_v63 = vmul.f32 0.00390625, %v150_v28  ;;  %v271_v57 = vsel %vm221_vm5, %v270_v17, %v266_v53 }
  0xfa   :  { %v166_v40 = vmul.f32 0.00390625, %v126_v34  ;;  %v222_v61 = vsel %vm221_vm5, %v220_v3, %v215_v51  ;;  %v651_v3 = vld [vmem:[#allocation10] ss:$0 sm:$0xff]  ;;  %v532_v51 = vsub.s32 1, %v1094_v29 }
  0xfb   :  { %v275_v22 = vrot.slane %v174_v63, %v226_v55 }
  0xfc   :  { %v153_v47 = vpop.xlane.xlu1 %152  ;;  %v227_v7 = vrot.slane %v166_v40, %v226_v55 }
  0xfd   :  { %v129_v50 = vpop.xlane.xlu0 %128  ;;  %v175_v43 = vmul.f32 0.00390625, %v153_v47  ;;  %v276_v49 = vsel %vm228_vm6, %v275_v22, %v271_v57 }
  0xfe   :  { %v167_v42 = vmul.f32 0.00390625, %v129_v50  ;;  %v229_v37 = vsel %vm228_vm6, %v227_v7, %v222_v61 }
  0xff   :  { %v280_v34 = vrot.slane %v175_v43, %v233_v56 }
 0x100   :  { %v156_v60 = vpop.xlane.xlu1 %155  ;;  %v234_v54 = vrot.slane %v167_v42, %v233_v56 }
 0x101   :  { %v132_v16 = vpop.xlane.xlu0 %131  ;;  %v176_v31 = vmul.f32 0.00390625, %v156_v60 }
 0x102   :  { %v168_v30 = vmul.f32 0.00390625, %v132_v16  ;;  %v236_v19 = vsel %vm235_vm7, %v234_v54, %v229_v37  ;;  %v497_v54 = vsub.s32 0, %v1094_v29 }
 0x103   :  { %v285_v50 = vrot.slane %v176_v31, %v240_v59  ;;  %v281_v31 = vsel %vm235_vm7, %v280_v34, %v276_v49 }
 0x104   :  { %v159_v48 = vpop.xlane.xlu1 %158  ;;  %v241_v58 = vrot.slane %v168_v30, %v240_v59 }
 0x105   :  { %v177_v28 = vmul.f32 0.00390625, %v159_v48  ;;  %v135_v36 = vpop.xlane.xlu0 %134  ;;  %v286_v56 = vsel %vm242_vm8, %v285_v50, %v281_v31 }
 0x106   :  { %v169_v47 = vmul.f32 0.00390625, %v135_v36  ;;  %v243_v59 = vsel %vm242_vm8, %v241_v58, %v236_v19 }
 0x107   :  { %v290_v60 = vrot.slane %v177_v28, %v247_v10 }
 0x108   :  { %v162_v52 = vpop.xlane.xlu1 %161  ;;  %v248_v55 = vrot.slane %v169_v47, %v247_v10 }
 0x109   :  { %v178_v43 = vmul.f32 0.00390625, %v162_v52  ;;  %v138_v36 = vpop.xlane.xlu0 %137  ;;  %v291_v62 = vsel %vm249_vm9, %v290_v60, %v286_v56 }
 0x10a   :  { %v170_v42 = vmul.f32 0.00390625, %v138_v36  ;;  %v250_v16 = vsel %vm249_vm9, %v248_v55, %v243_v59 }
 0x10b   :  { %v295_v30 = vrot.slane %v178_v43, %v254_v23 }
 0x10c   :  { %v255_v63 = vrot.slane %v170_v42, %v254_v23 }
 0x10d   :  { %v296_v35 = vsel %vm256_vm10, %v295_v30, %v291_v62 }
 0x10e   :  { %v257_v40 = vsel %vm256_vm10, %v255_v63, %v250_v16 }
 0x10f   :  { %v298_v10 = vsel %vm297_vm11, %v296_v35, %v257_v40  ;;  %v1189_v35 = vld [vmem:[#allocation16_spill] sm:$0xff] }
 0x110   :  { %676 = vmatmul.mubr.msk.f32.vlgmr.msra.gmra.mrb[0].mxu0 %vm299_vm0, %v298_v10  ;;  %v1190_v10 = vld [vmem:[#allocation19_spill] sm:$0xff] }
 0x1e3   :  { %v371_v46 = vpop.f32.mrb[0].mxu0 }
 0x1e4   :  { %v372_v11 = vadd.f32 %v648_v41, %v371_v46  ;;  %v677_v17 = vpop.f32.mrb[1].mxu0  ;;  %v1191_v46 = vld [vmem:[#allocation20_spill] sm:$0xff] }
 0x1e6   :  { %v375_v48 = vmax.f32 %v372_v11, 0.0  ;;  %v1193_v11 = vld [vmem:[#allocation18_spill] sm:$0xff] }
 0x1e8   :  { %695 = vmatmul.mubr.msk.f32.vlgmr.msra.gmra.mrb[0].mxu1 %vm391_vm2, %v375_v48  ;;  %v1194_v48 = vld [vmem:[#allocation21_spill] sm:$0xff] }
 0x2bb   :  { %v485_v22 = vpop.f32.mrb[0].mxu1 }
 0x2bc   :  { %v486_v28 = vadd.f32 %v651_v3, %v485_v22  ;;  %v696_v7 = vpop.f32.mrb[1].mxu1  ;;  %v1195_v22 = vld [vmem:[#allocation22_spill] sm:$0xff] }
 0x2be   :  { %v661_v34 = vmul.f32 -1.442695, %v486_v28 }
 0x2c0   :  { %726 = vpow2.f32 %v661_v34 }
 0x2ca   :  { %v727_v47 = vpop.eup %726 }
 0x2cb   :  { %v492_v53 = vadd.f32 1.0, %v727_v47 }
 0x2cd   :  { %728 = vrcp.f32 %v492_v53 }
 0x2d7   :  { %v729_v50 = vpop.eup %728 }
 0x2d8   :  { %v498_v23 = vrot.slane %v729_v50, %v497_v54  ;;  %v533_v57 = vrot.slane %v729_v50, %v532_v51 }
 0x2da   :  { %504 = vbcast.lane.b32.xlu1 %v498_v23, 264  ;;  %500 = vbcast.lane.b32.xlu0 %v498_v23, 256 }
 0x2de   :  { %508 = vbcast.lane.b32.xlu1 %v498_v23, 272  ;;  %516 = vbcast.lane.b32.xlu0 %v498_v23, 288 }
 0x2e2   :  { %512 = vbcast.lane.b32.xlu1 %v498_v23, 280  ;;  %524 = vbcast.lane.b32.xlu0 %v498_v23, 304 }
 0x2e6   :  { %520 = vbcast.lane.b32.xlu1 %v498_v23, 296  ;;  %535 = vbcast.lane.b32.xlu0 %v533_v57, 256 }
 0x2ea   :  { %528 = vbcast.lane.b32.xlu1 %v498_v23, 312  ;;  %543 = vbcast.lane.b32.xlu0 %v533_v57, 272 }
 0x2ee   :  { %539 = vbcast.lane.b32.xlu1 %v533_v57, 264  ;;  %551 = vbcast.lane.b32.xlu0 %v533_v57, 288 }
 0x2f2   :  { %547 = vbcast.lane.b32.xlu1 %v533_v57, 280  ;;  %559 = vbcast.lane.b32.xlu0 %v533_v57, 304 }
 0x2f6   :  { %555 = vbcast.lane.b32.xlu1 %v533_v57, 296 }
 0x2fa   :  { %563 = vbcast.lane.b32.xlu1 %v533_v57, 312 }
 0x34c   :  { %v505_v58 = vpop.permute.xlu1 %504  ;;  %v501_v60 = vpop.permute.xlu0 %500 }
 0x34d   :  { %v567_v52 = vmul.f32 %v505_v58, %v999_v8  ;;  %v568_v61 = vmul.f32 %v505_v58, %v1001_v9  ;;  %v565_v29 = vmul.f32 %v501_v60, %v987_v2  ;;  %v566_v49 = vmul.f32 %v501_v60, %v991_v4 }
 0x34f   :  { %599 = vst [vmem:[#allocation11 + $0x10] sm:$0xff] %v567_v52  ;;  %600 = vst [vmem:[#allocation11 + $0x18] sm:$0xff] %v568_v61 }
 0x350   :  { %597 = vst [vmem:[#allocation11] sm:$0xff] %v565_v29  ;;  %598 = vst [vmem:[#allocation11 + $0x8] sm:$0xff] %v566_v49  ;;  %v509_v55 = vpop.permute.xlu1 %508  ;;  %v517_v43 = vpop.permute.xlu0 %516 }
 0x351   :  { %v569_v36 = vmul.f32 %v509_v55, %v1011_v14  ;;  %v570_v37 = vmul.f32 %v509_v55, %v1013_v15  ;;  %v573_v31 = vmul.f32 %v517_v43, %v1035_v26  ;;  %v574_v8 = vmul.f32 %v517_v43, %v1037_v27 }
 0x353   :  { %601 = vst [vmem:[#allocation11 + $0x20] sm:$0xff] %v569_v36  ;;  %602 = vst [vmem:[#allocation11 + $0x28] sm:$0xff] %v570_v37 }
 0x354   :  { %605 = vst [vmem:[#allocation11 + $0x40] sm:$0xff] %v573_v31  ;;  %606 = vst [vmem:[#allocation11 + $0x48] sm:$0xff] %v574_v8  ;;  %v513_v2 = vpop.permute.xlu1 %512  ;;  %v525_v4 = vpop.permute.xlu0 %524 }
 0x355   :  { %v571_v9 = vmul.f32 %v513_v2, %v1023_v20  ;;  %v572_v42 = vmul.f32 %v513_v2, %v1025_v21  ;;  %v577_v19 = vmul.f32 %v525_v4, %v1059_v38  ;;  %v578_v14 = vmul.f32 %v525_v4, %v1061_v39 }
 0x357   :  { %603 = vst [vmem:[#allocation11 + $0x30] sm:$0xff] %v571_v9  ;;  %604 = vst [vmem:[#allocation11 + $0x38] sm:$0xff] %v572_v42 }
 0x358   :  { %609 = vst [vmem:[#allocation11 + $0x60] sm:$0xff] %v577_v19  ;;  %610 = vst [vmem:[#allocation11 + $0x68] sm:$0xff] %v578_v14  ;;  %v521_v15 = vpop.permute.xlu1 %520  ;;  %v536_v26 = vpop.permute.xlu0 %535 }
 0x359   :  { %v575_v27 = vmul.f32 %v521_v15, %v1047_v32  ;;  %v576_v56 = vmul.f32 %v521_v15, %v1049_v33  ;;  %v581_v30 = vmul.f32 %v536_v26, %v983_v0  ;;  %v582_v20 = vmul.f32 %v536_v26, %v985_v1 }
 0x35b   :  { %607 = vst [vmem:[#allocation11 + $0x50] sm:$0xff] %v575_v27  ;;  %608 = vst [vmem:[#allocation11 + $0x58] sm:$0xff] %v576_v56 }
 0x35c   :  { %613 = vst [vmem:[#allocation11 + $0x80] sm:$0xff] %v581_v30  ;;  %614 = vst [vmem:[#allocation11 + $0x88] sm:$0xff] %v582_v20  ;;  %v529_v21 = vpop.permute.xlu1 %528  ;;  %v544_v38 = vpop.permute.xlu0 %543 }
 0x35d   :  { %v579_v39 = vmul.f32 %v529_v21, %v1071_v44  ;;  %v580_v59 = vmul.f32 %v529_v21, %v1073_v45  ;;  %v585_v62 = vmul.f32 %v544_v38, %v1007_v12  ;;  %v586_v32 = vmul.f32 %v544_v38, %v1009_v13 }
 0x35f   :  { %611 = vst [vmem:[#allocation11 + $0x70] sm:$0xff] %v579_v39  ;;  %612 = vst [vmem:[#allocation11 + $0x78] sm:$0xff] %v580_v59 }
 0x360   :  { %617 = vst [vmem:[#allocation11 + $0xa0] sm:$0xff] %v585_v62  ;;  %618 = vst [vmem:[#allocation11 + $0xa8] sm:$0xff] %v586_v32  ;;  %v540_v0 = vpop.permute.xlu1 %539  ;;  %v552_v1 = vpop.permute.xlu0 %551 }
 0x361   :  { %v583_v33 = vmul.f32 %v540_v0, %v993_v5  ;;  %v584_v63 = vmul.f32 %v540_v0, %v995_v6  ;;  %v589_v16 = vmul.f32 %v552_v1, %v1031_v24  ;;  %v590_v44 = vmul.f32 %v552_v1, %v1033_v25  ;;  %v1192_v24 = vld [vmem:[#allocation17_spill] sm:$0xff] }
 0x363   :  { %615 = vst [vmem:[#allocation11 + $0x90] sm:$0xff] %v583_v33  ;;  %616 = vst [vmem:[#allocation11 + $0x98] sm:$0xff] %v584_v63 }
 0x364   :  { %621 = vst [vmem:[#allocation11 + $0xc0] sm:$0xff] %v589_v16  ;;  %622 = vst [vmem:[#allocation11 + $0xc8] sm:$0xff] %v590_v44  ;;  %v548_v12 = vpop.permute.xlu1 %547  ;;  %v560_v13 = vpop.permute.xlu0 %559 }
 0x365   :  { %v587_v45 = vmul.f32 %v548_v12, %v1019_v18  ;;  %v588_v40 = vmul.f32 %v548_v12, %v1189_v35  ;;  %v593_v41 = vmul.f32 %v560_v13, %v1190_v10  ;;  %v594_v5 = vmul.f32 %v560_v13, %v1191_v46 }
 0x367   :  { %619 = vst [vmem:[#allocation11 + $0xb0] sm:$0xff] %v587_v45  ;;  %620 = vst [vmem:[#allocation11 + $0xb8] sm:$0xff] %v588_v40 }
 0x368   :  { %625 = vst [vmem:[#allocation11 + $0xe0] sm:$0xff] %v593_v41  ;;  %626 = vst [vmem:[#allocation11 + $0xe8] sm:$0xff] %v594_v5  ;;  %v556_v6 = vpop.permute.xlu1 %555 }
 0x369   :  { %v591_v25 = vmul.f32 %v556_v6, %v1192_v24  ;;  %v592_v17 = vmul.f32 %v556_v6, %v1193_v11 }
 0x36b   :  { %623 = vst [vmem:[#allocation11 + $0xd0] sm:$0xff] %v591_v25  ;;  %624 = vst [vmem:[#allocation11 + $0xd8] sm:$0xff] %v592_v17 }
 0x36c   :  { %v564_v18 = vpop.permute.xlu1 %563 }
 0x36d   :  { %v595_v3 = vmul.f32 %v564_v18, %v1194_v48  ;;  %v596_v28 = vmul.f32 %v564_v18, %v1195_v22 }
 0x36f   :  { %627 = vst [vmem:[#allocation11 + $0xf0] sm:$0xff] %v595_v3  ;;  %628 = vst [vmem:[#allocation11 + $0xf8] sm:$0xff] %v596_v28 }
 0x370   :  { %851 = shalt.err (!%p848_p2)
}
 0x371   :  { %s852_s9 = scalar_lea.hbm %s1172_s5, 4096 }
 0x372   :  { %p853_p3 = scmp.ne.s32.totalorder %s1172_s5, %s852_s9  ;;  %p856_p4 = scmp.lt.u32.totalorder %s852_s9, %s1172_s5 }
 0x374   :  { %p858_p5 = pnand %p856_p4, %p853_p3 }
 0x376   :  { %861 = shalt.err (!%p858_p5)
}
 0x377   :  { %640 = dma.vmem_to_hbm [thread:$0]  %s635_s30, 4096, %s1172_s5, [#allocation4], %s875_s3, %s875_s3, %s876_s21  }
 0x378   :  { %868 = dma.done.wait [#allocation4], 4096  }
 0x379   :  { %869 = vsyncadd [#allocation4], 4294963200 }
 0x37a   :  { %644 = vsyncpa [#allocation3], 1 }
 0x37b   :  { %645 = vsyncpa [#allocation6], 1 }
 0x37c   :  { %646 = vsyncpa [#allocation9], 1 }
 0x37d   :  { %647 = vsyncpa [#allocation4], 1 }

</bundles_post_ra>
